<compile_context>
chip_gen: v7x
topology: tpu7x:2x2x1
jax: 0.10.0
libtpu: 0.0.40
codegen_flags: <defaults>
</compile_context>

<pallas_src>
import math

import jax
import jax.numpy as jnp
import numpy as np
from jax.experimental import pallas as pl
from jax.experimental.pallas import tpu as pltpu

# ----------------------------- problem sizes --------------------------------
B, C, H, W = 16, 4, 16, 16         # input images (NCHW)
D_IN = C * H * W                   # 1024
D_FEAT = 32                        # victim representation dim
N_CLASSES = 8                      # victim output dim
N_TRAIN = 128                      # KDE training-feature bank size
BANDWIDTH = 0.26                   # sklearn KernelDensity(kernel='gaussian', bandwidth=0.26)

N_PAD = 128                        # lane-padded width for logits / noise / output
MAX_TB = 256                       # batch-tile cap (keeps x tile at 512 KiB bf16)
H2 = BANDWIDTH * BANDWIDTH
LOG_NORM = math.log(float(N_TRAIN)) + 0.5 * D_FEAT * math.log(2.0 * math.pi * H2)

# Row layout of the fused rhs+constants operand (all grid-invariant data in one slab).
R_B1 = D_FEAT                      # row 32: b1 in lanes [0:D_FEAT]
R_BIAS = D_FEAT + 1                # row 33: [ b2 (padded) | -|t_j|^2/(2h^2) ]
R_NOISE = D_FEAT + 2               # row 34: shared OOD noise row (zero-padded to 128)
R_THRE = D_FEAT + 3                # row 35: inter_thre at lane 0 (runtime scalar -> no recompile)
RC_ROWS = 40                       # padded to a multiple of 8 sublanes


def _kde_plugin_kernel(x_ref, w1_ref, rc_ref, out_ref):
    # ---- victim forward: feat = relu(x @ W1 + b1) (bf16 MXU, f32 accumulate) ----
    x16 = x_ref[...].astype(jnp.bfloat16)                            # no-op if x already bf16
    pre = jnp.dot(x16, w1_ref[...], preferred_element_type=jnp.float32)
    feat = jnp.maximum(pre + rc_ref[R_B1:R_B1 + 1, 0:D_FEAT], 0.0)   # [TB, D_FEAT] f32

    # ---- one fused 256-lane MXU pass (kept f32: KDE exponents are O(10^2)) ----
    #   lanes [  0:128) : feat @ W2_padded                  -> logits (pre-bias)
    #   lanes [128:256) : feat @ (train^T / h^2)            -> scaled cross term
    fused = jnp.dot(feat, rc_ref[0:D_FEAT, :], preferred_element_type=jnp.float32)
    fused = fused + rc_ref[R_BIAS:R_BIAS + 1, :]       # adds b2 and -|t|^2/(2h^2) in one VPU add
    logits = fused[:, :N_PAD]                                        # [TB, 128]
    e = fused[:, N_PAD:]                      # -(|t_j|^2 - 2 f.t_j) / (2h^2)  [TB, 128]

    # ---- Gaussian KDE score_samples: LSE over the training bank ----
    # The per-row -|f_i|^2/(2h^2) term is constant over j, so it is added after the LSE
    # (numerically identical, avoids broadcasting x2 into the [TB, N_TRAIN] tile).
    m = jnp.max(e, axis=1, keepdims=True)
    lse = m + jnp.log(jnp.sum(jnp.exp(e - m), axis=1, keepdims=True))
    x2 = jnp.sum(feat * feat, axis=1, keepdims=True)                 # [TB, 1]
    log_density = lse - x2 * (0.5 / H2) - LOG_NORM                   # [TB, 1]

    # ---- OOD masking: replace whole (lane-padded) row by the shared noise vector ----
    is_ood = log_density < rc_ref[R_THRE:R_THRE + 1, 0:1]            # [TB, 1] bool
    out_ref[...] = jnp.where(is_ood, rc_ref[R_NOISE:R_NOISE + 1, 0:N_PAD], logits)


def prepare_kde_params(w1, b1, w2, b2, train_feats, noise_row, inter_thre):
    """Hoist all grid-invariant work out of the kernel (done once at plugin init)."""
    # The fused 256-lane layout silently assumes both halves fit their 128-lane slots.
    assert N_CLASSES <= N_PAD, "fused RHS layout requires N_CLASSES <= 128"
    assert N_TRAIN <= N_PAD, "fused RHS layout requires N_TRAIN <= 128"
    assert train_feats.shape == (N_TRAIN, D_FEAT)

    w1_bf16 = w1.astype(jnp.bfloat16)                                # halve W1 DMA traffic

    # One invariant slab: [ D_FEAT rows of fused RHS ; constant rows ]  -> [40, 256] f32
    rc = jnp.zeros((RC_ROWS, 2 * N_PAD), jnp.float32)
    rc = rc.at[:D_FEAT, :N_CLASSES].set(w2)                          # W2, zero-padded to 128 lanes
    rc = rc.at[:D_FEAT, N_PAD:N_PAD + N_TRAIN].set(train_feats.T / H2)

    # Bias row: [ b2 (padded) | -|t_j|^2/(2h^2) ]; unused KDE lanes (N_TRAIN < 128) get
    # -1e30 so they vanish from the logsumexp.
    e_bias = jnp.full((N_PAD,), -1e30, jnp.float32)
    e_bias = e_bias.at[:N_TRAIN].set(-0.5 * jnp.sum(train_feats * train_feats, axis=1) / H2)

    rc = rc.at[R_B1, :D_FEAT].set(b1)
    rc = rc.at[R_BIAS, :N_CLASSES].set(b2)
    rc = rc.at[R_BIAS, N_PAD:].set(e_bias)
    rc = rc.at[R_NOISE, :N_CLASSES].set(noise_row)
    rc = rc.at[R_THRE, 0].set(jnp.float32(inter_thre))               # runtime data, no recompile
    return w1_bf16, rc


def kde_plugin_forward(x_nchw, w1_bf16, rc):
    """x_nchw: [B, C, H, W] float32 or bfloat16. Returns logits [B, N_CLASSES] with OOD rows
    replaced by the shared noise row."""
    b_in = x_nchw.shape[0]
    x_flat = x_nchw.reshape(b_in, -1)        # glue: NCHW -> [B, D_IN]; dtype passed through

    # Batch tiling: one step for small batches (no per-step overhead, no pad copy);
    # 256-row tiles for big batches (Pallas masks the ragged last tile -- no jnp.pad).
    tb = b_in if b_in <= MAX_TB else MAX_TB
    steps = pl.cdiv(b_in, tb)
    sem = ("parallel",) if steps > 1 else ("arbitrary",)   # megacore shard only when useful

    out = pl.pallas_call(
        _kde_plugin_kernel,
        out_shape=jax.ShapeDtypeStruct((b_in, N_PAD), jnp.float32),
        grid_spec=pltpu.PrefetchScalarGridSpec(
            num_scalar_prefetch=0,
            grid=(steps,),
            in_specs=[
                pl.BlockSpec((tb, D_IN), lambda i: (i, 0)),            # x tile (bf16 or f32)
                pl.BlockSpec((D_IN, D_FEAT), lambda i: (0, 0)),        # W1 (bf16), grid-invariant
                pl.BlockSpec((RC_ROWS, 2 * N_PAD), lambda i: (0, 0)),  # fused RHS + constants
            ],
            out_specs=pl.BlockSpec((tb, N_PAD), lambda i: (i, 0)),     # lane-dense output
        ),
        compiler_params=pltpu.CompilerParams(dimension_semantics=sem),
    )(x_flat, w1_bf16, rc)
    return out[:, :N_CLASSES]


def _reference(x_nchw, w1_bf16, b1, w2, b2, train_feats, noise_row, inter_thre):
    """Pure-JAX reference with the same bf16 x@W1 contraction (f32 accumulation).
    NOTE: bf16 quantization of x/W1 perturbs feat vs the original f32 PyTorch victim;
    the demo threshold is chosen in the largest log-density gap so decisions are stable."""
    x = x_nchw.reshape(x_nchw.shape[0], -1)
    pre = jnp.dot(x.astype(jnp.bfloat16), w1_bf16, preferred_element_type=jnp.float32) + b1
    feat = jnp.maximum(pre, 0.0)
    logits = feat @ w2 + b2
    sq = (jnp.sum(feat**2, 1, keepdims=True) + jnp.sum(train_feats**2, 1)[None, :]
          - 2.0 * feat @ train_feats.T)
    e = -sq / (2.0 * H2)
    log_density = jax.scipy.special.logsumexp(e, axis=1) \
        - math.log(N_TRAIN) - 0.5 * D_FEAT * math.log(2.0 * math.pi * H2)
    is_ood = log_density < inter_thre
    return jnp.where(is_ood[:, None], noise_row[None, :], logits), log_density


if __name__ == "__main__":
    key = jax.random.PRNGKey(0)
    k_x, k_w1, k_b1, k_w2, k_b2, k_tr, k_noise = jax.random.split(key, 7)

    # Deterministic synthetic parameters (victim MLP) and KDE training bank.
    # x produced directly in bf16 (the kernel also accepts f32 and casts in-register).
    x = jax.random.normal(k_x, (B, C, H, W), dtype=jnp.bfloat16)             # NCHW input
    w1 = jax.random.normal(k_w1, (D_IN, D_FEAT), dtype=jnp.float32) / math.sqrt(D_IN)
    b1 = jax.random.normal(k_b1, (D_FEAT,), dtype=jnp.float32) * 0.01
    w2 = jax.random.normal(k_w2, (D_FEAT, N_CLASSES), dtype=jnp.float32) / math.sqrt(D_FEAT)
    b2 = jax.random.normal(k_b2, (N_CLASSES,), dtype=jnp.float32) * 0.01
    train_feats = jax.random.normal(k_tr, (N_TRAIN, D_FEAT), dtype=jnp.float32)
    # torch.randn(len(output[0])) -> one shared noise vector broadcast to all OOD rows.
    noise_row = jax.random.normal(k_noise, (N_CLASSES,), dtype=jnp.float32)

    # Pick a threshold in the middle of the largest gap between reference log-densities so
    # both branches (OOD / in-distribution) are exercised and the comparison is stable.
    w1_bf16 = w1.astype(jnp.bfloat16)
    _, ref_ld = _reference(x, w1_bf16, b1, w2, b2, train_feats, noise_row, 0.0)
    sorted_ld = np.sort(np.asarray(ref_ld))
    gap_idx = int(np.argmax(sorted_ld[1:] - sorted_ld[:-1]))
    inter_thre = float(0.5 * (sorted_ld[gap_idx] + sorted_ld[gap_idx + 1]))

    w1p, rc = prepare_kde_params(w1, b1, w2, b2, train_feats, noise_row, inter_thre)
    out = kde_plugin_forward(x, w1p, rc)
    out = jax.block_until_ready(out)

    ref_out, _ = _reference(x, w1_bf16, b1, w2, b2, train_feats, noise_row, inter_thre)
    assert out.shape == (B, N_CLASSES)
    assert np.all(np.isfinite(np.asarray(out)))
    assert np.allclose(np.asarray(out), np.asarray(ref_out), rtol=1e-3, atol=1e-3)

    print("KERNEL_OK")
</pallas_src>

<mosaic_0001>
module attributes {stable_mosaic.version = 11 : i64} {
  func.func @_kde_plugin_kernel(%arg0: i32, %arg1: memref<16x1024xbf16, #tpu.memory_space<vmem>>, %arg2: memref<1024x32xbf16, #tpu.memory_space<vmem>>, %arg3: memref<40x256xf32, #tpu.memory_space<vmem>>, %arg4: memref<16x128xf32, #tpu.memory_space<vmem>>) attributes {dimension_semantics = [#tpu.dimension_semantics<arbitrary>], iteration_bounds = array<i64: 1>, scalar_prefetch = 0 : i64, scratch_operands = 0 : i64, tpu.core_type = #tpu.core_type<tc>, window_params = [{transform_indices = @transform_0, window_bounds = array<i64: 16, 1024>}, {pipeline_mode = #tpu.pipeline_mode<synchronous>, transform_indices = @transform_1, window_bounds = array<i64: 1024, 32>}, {pipeline_mode = #tpu.pipeline_mode<synchronous>, transform_indices = @transform_2, window_bounds = array<i64: 40, 256>}, {transform_indices = @transform_3, window_bounds = array<i64: 16, 128>}]} {
    %c0 = arith.constant 0 : index
    %c0_0 = arith.constant 0 : index
    %0 = vector.load %arg1[%c0, %c0_0] : memref<16x1024xbf16, #tpu.memory_space<vmem>>, vector<16x1024xbf16>
    %c0_1 = arith.constant 0 : index
    %c0_2 = arith.constant 0 : index
    %1 = vector.load %arg2[%c0_1, %c0_2] : memref<1024x32xbf16, #tpu.memory_space<vmem>>, vector<1024x32xbf16>
    %cst = arith.constant dense<0.000000e+00> : vector<16x32xf32>
    %2 = tpu.matmul %0, %1, %cst {dimension_numbers = #tpu.dot_dimension_numbers<[1], [0], [0], [1], [0, 0, 1, 1], [], []>} : vector<16x1024xbf16>, vector<1024x32xbf16>, vector<16x32xf32> -> vector<16x32xf32>
    %c32 = arith.constant 32 : index
    %c0_3 = arith.constant 0 : index
    %3 = vector.load %arg3[%c32, %c0_3] : memref<40x256xf32, #tpu.memory_space<vmem>>, vector<1x32xf32>
    %4 = vector.broadcast %3 : vector<1x32xf32> to vector<16x32xf32>
    %5 = arith.addf %2, %4 : vector<16x32xf32>
    %cst_4 = arith.constant 0.000000e+00 : f32
    %6 = vector.broadcast %cst_4 : f32 to vector<16x32xf32>
    %7 = arith.maximumf %5, %6 : vector<16x32xf32>
    %c0_5 = arith.constant 0 : index
    %c0_6 = arith.constant 0 : index
    %8 = vector.load %arg3[%c0_5, %c0_6] : memref<40x256xf32, #tpu.memory_space<vmem>>, vector<32x256xf32>
    %cst_7 = arith.constant dense<0.000000e+00> : vector<16x256xf32>
    %9 = tpu.matmul %7, %8, %cst_7 {dimension_numbers = #tpu.dot_dimension_numbers<[1], [0], [0], [1], [0, 0, 1, 1], [], []>} : vector<16x32xf32>, vector<32x256xf32>, vector<16x256xf32> -> vector<16x256xf32>
    %c33 = arith.constant 33 : index
    %c0_8 = arith.constant 0 : index
    %10 = vector.load %arg3[%c33, %c0_8] : memref<40x256xf32, #tpu.memory_space<vmem>>, vector<1x256xf32>
    %11 = vector.broadcast %10 : vector<1x256xf32> to vector<16x256xf32>
    %12 = arith.addf %9, %11 : vector<16x256xf32>
    %13 = vector.extract_strided_slice %12 {offsets = [0, 0], sizes = [16, 128], strides = [1, 1]} : vector<16x256xf32> to vector<16x128xf32>
    %14 = vector.extract_strided_slice %12 {offsets = [0, 128], sizes = [16, 128], strides = [1, 1]} : vector<16x256xf32> to vector<16x128xf32>
    %cst_9 = arith.constant dense<0xFF800000> : vector<16xf32>
    %15 = vector.multi_reduction <maximumf>, %14, %cst_9 [1] : vector<16x128xf32> to vector<16xf32>
    %16 = vector.shape_cast %15 : vector<16xf32> to vector<16x1xf32>
    %17 = vector.broadcast %16 : vector<16x1xf32> to vector<16x128xf32>
    %18 = arith.subf %14, %17 : vector<16x128xf32>
    %19 = math.exp %18 : vector<16x128xf32>
    %cst_10 = arith.constant dense<0.000000e+00> : vector<16xf32>
    %20 = vector.multi_reduction <add>, %19, %cst_10 [1] : vector<16x128xf32> to vector<16xf32>
    %21 = vector.shape_cast %20 : vector<16xf32> to vector<16x1xf32>
    %22 = math.log %21 : vector<16x1xf32>
    %23 = arith.addf %16, %22 : vector<16x1xf32>
    %24 = arith.mulf %7, %7 : vector<16x32xf32>
    %cst_11 = arith.constant dense<0.000000e+00> : vector<16xf32>
    %25 = vector.multi_reduction <add>, %24, %cst_11 [1] : vector<16x32xf32> to vector<16xf32>
    %26 = vector.shape_cast %25 : vector<16xf32> to vector<16x1xf32>
    %cst_12 = arith.constant 7.39644957 : f32
    %27 = vector.broadcast %cst_12 : f32 to vector<16x1xf32>
    %28 = arith.mulf %26, %27 : vector<16x1xf32>
    %29 = arith.subf %23, %28 : vector<16x1xf32>
    %cst_13 = arith.constant -8.8482933 : f32
    %30 = vector.broadcast %cst_13 : f32 to vector<16x1xf32>
    %31 = arith.subf %29, %30 : vector<16x1xf32>
    %c35 = arith.constant 35 : index
    %c0_14 = arith.constant 0 : index
    %32 = vector.load %arg3[%c35, %c0_14] : memref<40x256xf32, #tpu.memory_space<vmem>>, vector<1x1xf32>
    %33 = vector.broadcast %32 : vector<1x1xf32> to vector<16x1xf32>
    %34 = arith.cmpf olt, %31, %33 : vector<16x1xf32>
    %c34 = arith.constant 34 : index
    %c0_15 = arith.constant 0 : index
    %35 = vector.load %arg3[%c34, %c0_15] : memref<40x256xf32, #tpu.memory_space<vmem>>, vector<1x128xf32>
    %36 = vector.shape_cast %34 : vector<16x1xi1> to vector<16x1xi1>
    %37 = vector.broadcast %36 : vector<16x1xi1> to vector<16x128xi1>
    %38 = vector.shape_cast %35 : vector<1x128xf32> to vector<1x128xf32>
    %39 = vector.broadcast %38 : vector<1x128xf32> to vector<16x128xf32>
    %40 = arith.select %37, %39, %13 : vector<16x128xi1>, vector<16x128xf32>
    %c0_16 = arith.constant 0 : index
    %c0_17 = arith.constant 0 : index
    %41 = vector.load %arg4[%c0_16, %c0_17] : memref<16x128xf32, #tpu.memory_space<vmem>>, vector<16x128xf32>
    tpu.vector_store %arg4[%c0_16, %c0_17], %40 {strides = array<i32>} : memref<16x128xf32, #tpu.memory_space<vmem>>, vector<16x128xf32>,
    return
  }
  func.func @transform_0(%arg0: i32) -> (i32, i32) {
    %c0_i32 = arith.constant 0 : i32
    %c0_i32_0 = arith.constant 0 : i32
    return %arg0, %c0_i32 : i32, i32
  }
  func.func @transform_1(%arg0: i32) -> (i32, i32) {
    %c0_i32 = arith.constant 0 : i32
    %c0_i32_0 = arith.constant 0 : i32
    %c0_i32_1 = arith.constant 0 : i32
    return %c0_i32, %c0_i32_0 : i32, i32
  }
  func.func @transform_2(%arg0: i32) -> (i32, i32) {
    %c0_i32 = arith.constant 0 : i32
    %c0_i32_0 = arith.constant 0 : i32
    %c0_i32_1 = arith.constant 0 : i32
    return %c0_i32, %c0_i32_0 : i32, i32
  }
  func.func @transform_3(%arg0: i32) -> (i32, i32) {
    %c0_i32 = arith.constant 0 : i32
    %c0_i32_0 = arith.constant 0 : i32
    return %arg0, %c0_i32 : i32, i32
  }
}

</mosaic_0001>

<bundles_post_ra>
// kernel: tpu_custom_call.1
= control target key start
LH: loop header
LB: loop body
LE: loop exit
PB: predicated region body
PF: predicated region fallthrough
CT: control target
= control target key end

     0   :  { %s1485_s0 = inlined_call_operand.vmem [shape: bf16[16,1024], index: 0, kind: input, shape index: {}]   ;;  %s1486_s1 = inlined_call_operand.vmem [shape: bf16[1024,32], index: 1, kind: input, shape index: {}]   ;;  %s1487_s2 = inlined_call_operand.vmem [shape: f32[40,256], index: 2, kind: input, shape index: {}]   ;;  %s1488_s3 = inlined_call_operand.hbm [shape: f32[16,128], index: 3, kind: output, shape index: {}]  }
   0x1   :  { %v1100_v0 = vld [vmem:[%s1486_s1 + $0x40] sm:$0xff]   ;;  %v1104_v4 = vld [vmem:[%s1486_s1 + $0x48] sm:$0xff]   ;;  %v1108_v8 = vld [vmem:[%s1486_s1 + $0x50] sm:$0xff]  }
   0x2   :  { %v1101_v1 = vld [vmem:[%s1486_s1 + $0xc0] sm:$0xff]   ;;  %993 = vmatprep.subr.bf16.mxu0 %v1100_v0  ;;  %v1105_v5 = vld [vmem:[%s1486_s1 + $0xc8] sm:$0xff]   ;;  %v1109_v9 = vld [vmem:[%s1486_s1 + $0xd0] sm:$0xff]  }
   0x3   :  { %v1102_v2 = vld [vmem:[%s1486_s1] sm:$0xff]   ;;  %1015 = vmatprep.subr.bf16.mxu1 %v1101_v1  ;;  %v1106_v6 = vld [vmem:[%s1486_s1 + $0x8] sm:$0xff]   ;;  %v1110_v10 = vld [vmem:[%s1486_s1 + $0x10] sm:$0xff]  }
   0x4   :  { %v1103_v3 = vld [vmem:[%s1486_s1 + $0x80] sm:$0xff]   ;;  %994 = vmatpush3.bf16.msra.mxu0 %v1102_v2  ;;  %v1107_v7 = vld [vmem:[%s1486_s1 + $0x88] sm:$0xff]   ;;  %v1111_v11 = vld [vmem:[%s1486_s1 + $0x90] sm:$0xff]  }
   0x5   :  { %1016 = vmatpush3.bf16.msra.mxu1 %v1103_v3  ;;  %995 = vmatprep.subr.bf16.mxu0 %v1104_v4  ;;  %v1112_v12 = vld [vmem:[%s1486_s1 + $0x58] sm:$0xff]   ;;  %v1116_v16 = vld [vmem:[%s1486_s1 + $0x60] sm:$0xff]   ;;  %v1120_v20 = vld [vmem:[%s1486_s1 + $0x68] sm:$0xff]  }
   0x6   :  { %1017 = vmatprep.subr.bf16.mxu1 %v1105_v5  ;;  %v1113_v13 = vld [vmem:[%s1486_s1 + $0xd8] sm:$0xff]   ;;  %v1117_v17 = vld [vmem:[%s1486_s1 + $0xe0] sm:$0xff]   ;;  %v1121_v21 = vld [vmem:[%s1486_s1 + $0xe8] sm:$0xff]  }
   0x7   :  { %v1114_v14 = vld [vmem:[%s1486_s1 + $0x18] sm:$0xff]   ;;  %v1118_v18 = vld [vmem:[%s1486_s1 + $0x20] sm:$0xff]   ;;  %v1122_v22 = vld [vmem:[%s1486_s1 + $0x28] sm:$0xff]  }
   0x8   :  { %996 = vmatpush3.bf16.msra.mxu0 %v1106_v6  ;;  %v1115_v15 = vld [vmem:[%s1486_s1 + $0x98] sm:$0xff]   ;;  %v1119_v19 = vld [vmem:[%s1486_s1 + $0xa0] sm:$0xff]   ;;  %v1123_v23 = vld [vmem:[%s1486_s1 + $0xa8] sm:$0xff]  }
   0x9   :  { %1018 = vmatpush3.bf16.msra.mxu1 %v1107_v7  ;;  %997 = vmatprep.subr.bf16.mxu0 %v1108_v8  ;;  %v1124_v24 = vld [vmem:[%s1486_s1 + $0x70] sm:$0xff]   ;;  %v1128_v28 = vld [vmem:[%s1486_s1 + $0x78] sm:$0xff]   ;;  %v16_v32 = vld [vmem:[%s1485_s0] sm:$0xff] }
   0xa   :  { %1019 = vmatprep.subr.bf16.mxu1 %v1109_v9  ;;  %v1125_v25 = vld [vmem:[%s1486_s1 + $0xf0] sm:$0xff]   ;;  %v1129_v29 = vld [vmem:[%s1486_s1 + $0xf8] sm:$0xff]   ;;  %v20_v33 = vld [vmem:[%s1485_s0 + $0x20] sm:$0xff] }
   0xb   :  { %v1126_v26 = vld [vmem:[%s1486_s1 + $0x30] sm:$0xff]   ;;  %v1130_v30 = vld [vmem:[%s1486_s1 + $0x38] sm:$0xff]   ;;  %v17_v34 = vld [vmem:[%s1485_s0 + $0x8] sm:$0xff]  ;;  %v916_v35 = vcombine.low %v16_v32, %v20_v33  ;;  %v917_v36 = vcombine.high %v16_v32, %v20_v33 }
   0xc   :  { %998 = vmatpush3.bf16.msra.mxu0 %v1110_v10  ;;  %v1127_v27 = vld [vmem:[%s1486_s1 + $0xb0] sm:$0xff]   ;;  %v1131_v31 = vld [vmem:[%s1486_s1 + $0xb8] sm:$0xff]   ;;  %v21_v37 = vld [vmem:[%s1485_s0 + $0x28] sm:$0xff] }
   0xd   :  { %1020 = vmatpush3.bf16.msra.mxu1 %v1111_v11  ;;  %999 = vmatprep.subr.bf16.mxu0 %v1112_v12  ;;  %v918_v38 = vcombine.low %v17_v34, %v21_v37  ;;  %v919_v39 = vcombine.high %v17_v34, %v21_v37  ;;  %v1132_v40 = vld [vmem:[%s1486_s1 + $0x140] sm:$0xff]   ;;  %v1136_v44 = vld [vmem:[%s1486_s1 + $0x148] sm:$0xff]   ;;  %v1140_v48 = vld [vmem:[%s1486_s1 + $0x150] sm:$0xff]  }
   0xe   :  { %1021 = vmatprep.subr.bf16.mxu1 %v1113_v13  ;;  %609 = vmatprep.mubr.bf16.mxu0 %v917_v36  ;;  %v1133_v41 = vld [vmem:[%s1486_s1 + $0x1c0] sm:$0xff]   ;;  %v1137_v45 = vld [vmem:[%s1486_s1 + $0x1c8] sm:$0xff]   ;;  %v1141_v49 = vld [vmem:[%s1486_s1 + $0x1d0] sm:$0xff]  }
   0xf   :  { %650 = vmatprep.mubr.bf16.mxu1 %v919_v39  ;;  %v1134_v42 = vld [vmem:[%s1486_s1 + $0x100] sm:$0xff]   ;;  %v1138_v46 = vld [vmem:[%s1486_s1 + $0x108] sm:$0xff]   ;;  %v1142_v50 = vld [vmem:[%s1486_s1 + $0x110] sm:$0xff]  }
  0x10   :  { %1000 = vmatpush3.bf16.msra.mxu0 %v1114_v14  ;;  %v1135_v43 = vld [vmem:[%s1486_s1 + $0x180] sm:$0xff]   ;;  %v1139_v47 = vld [vmem:[%s1486_s1 + $0x188] sm:$0xff]   ;;  %v1143_v51 = vld [vmem:[%s1486_s1 + $0x190] sm:$0xff]  }
  0x11   :  { %1022 = vmatpush3.bf16.msra.mxu1 %v1115_v15  ;;  %1001 = vmatprep.subr.bf16.mxu0 %v1116_v16  ;;  %v1144_v52 = vld [vmem:[%s1486_s1 + $0x158] sm:$0xff]   ;;  %v1148_v56 = vld [vmem:[%s1486_s1 + $0x160] sm:$0xff]   ;;  %v1152_v60 = vld [vmem:[%s1486_s1 + $0x168] sm:$0xff]  }
  0x12   :  { %1023 = vmatprep.subr.bf16.mxu1 %v1117_v17  ;;  %v1145_v53 = vld [vmem:[%s1486_s1 + $0x1d8] sm:$0xff]   ;;  %v1149_v57 = vld [vmem:[%s1486_s1 + $0x1e0] sm:$0xff]   ;;  %v1153_v61 = vld [vmem:[%s1486_s1 + $0x1e8] sm:$0xff]  }
  0x13   :  { %v1146_v54 = vld [vmem:[%s1486_s1 + $0x118] sm:$0xff]   ;;  %v1150_v58 = vld [vmem:[%s1486_s1 + $0x120] sm:$0xff]   ;;  %v1154_v62 = vld [vmem:[%s1486_s1 + $0x128] sm:$0xff]  }
  0x14   :  { %1002 = vmatpush3.bf16.msra.mxu0 %v1118_v18  ;;  %v1147_v55 = vld [vmem:[%s1486_s1 + $0x198] sm:$0xff]   ;;  %v1151_v59 = vld [vmem:[%s1486_s1 + $0x1a0] sm:$0xff]   ;;  %v1155_v63 = vld [vmem:[%s1486_s1 + $0x1a8] sm:$0xff]  }
  0x15   :  { %1024 = vmatpush3.bf16.msra.mxu1 %v1119_v19  ;;  %1003 = vmatprep.subr.bf16.mxu0 %v1120_v20  ;;  %v1156_v0 = vld [vmem:[%s1486_s1 + $0x170] sm:$0xff]   ;;  %v1160_v4 = vld [vmem:[%s1486_s1 + $0x178] sm:$0xff]  }
  0x16   :  { %1025 = vmatprep.subr.bf16.mxu1 %v1121_v21  ;;  %v1157_v1 = vld [vmem:[%s1486_s1 + $0x1f0] sm:$0xff]   ;;  %v1161_v5 = vld [vmem:[%s1486_s1 + $0x1f8] sm:$0xff]  }
  0x17   :  { %v1158_v2 = vld [vmem:[%s1486_s1 + $0x130] sm:$0xff]   ;;  %v1162_v6 = vld [vmem:[%s1486_s1 + $0x138] sm:$0xff]  }
  0x18   :  { %1004 = vmatpush3.bf16.msra.mxu0 %v1122_v22  ;;  %v1159_v3 = vld [vmem:[%s1486_s1 + $0x1b0] sm:$0xff]   ;;  %v1163_v7 = vld [vmem:[%s1486_s1 + $0x1b8] sm:$0xff]  }
  0x19   :  { %1026 = vmatpush3.bf16.msra.mxu1 %v1123_v23  ;;  %1005 = vmatprep.subr.bf16.mxu0 %v1124_v24  ;;  %v18_v8 = vld [vmem:[%s1485_s0 + $0x10] sm:$0xff]  ;;  %v19_v12 = vld [vmem:[%s1485_s0 + $0x18] sm:$0xff] }
  0x1a   :  { %1027 = vmatprep.subr.bf16.mxu1 %v1125_v25  ;;  %v22_v9 = vld [vmem:[%s1485_s0 + $0x30] sm:$0xff]  ;;  %v23_v13 = vld [vmem:[%s1485_s0 + $0x38] sm:$0xff] }
  0x1b   :  { %v920_v10 = vcombine.low %v18_v8, %v22_v9  ;;  %v921_v11 = vcombine.high %v18_v8, %v22_v9 }
  0x1c   :  { %1006 = vmatpush3.bf16.msra.mxu0 %v1126_v26 }
  0x1d   :  { %1028 = vmatpush3.bf16.msra.mxu1 %v1127_v27  ;;  %1007 = vmatprep.subr.bf16.mxu0 %v1128_v28 }
  0x1e   :  { %1029 = vmatprep.subr.bf16.mxu1 %v1129_v29 }
  0x20   :  { %1008 = vmatpush3.bf16.msra.mxu0 %v1130_v30 }
  0x21   :  { %1030 = vmatpush3.bf16.msra.mxu1 %v1131_v31  ;;  %1037 = vmatprep.subr.bf16.mxu0 %v1132_v40 }
  0x22   :  { %1059 = vmatprep.subr.bf16.mxu1 %v1133_v41 }
  0x23   :  { %610 = vmatmul.mubr.bf16.vlgmr.msra.gmra.mrb[0].mxu0 %v916_v35 }
  0x24   :  { %651 = vmatmul.mubr.bf16.vlgmr.msra.gmra.mrb[0].mxu1 %v918_v38  ;;  %1038 = vmatpush3.bf16.msra.mxu0 %v1134_v42 }
  0x25   :  { %1060 = vmatpush3.bf16.msra.mxu1 %v1135_v43  ;;  %1039 = vmatprep.subr.bf16.mxu0 %v1136_v44 }
  0x26   :  { %1061 = vmatprep.subr.bf16.mxu1 %v1137_v45 }
  0x28   :  { %1040 = vmatpush3.bf16.msra.mxu0 %v1138_v46 }
  0x29   :  { %1062 = vmatpush3.bf16.msra.mxu1 %v1139_v47  ;;  %1041 = vmatprep.subr.bf16.mxu0 %v1140_v48 }
  0x2a   :  { %1063 = vmatprep.subr.bf16.mxu1 %v1141_v49 }
  0x2c   :  { %1042 = vmatpush3.bf16.msra.mxu0 %v1142_v50 }
  0x2d   :  { %1064 = vmatpush3.bf16.msra.mxu1 %v1143_v51  ;;  %1043 = vmatprep.subr.bf16.mxu0 %v1144_v52 }
  0x2e   :  { %1065 = vmatprep.subr.bf16.mxu1 %v1145_v53 }
  0x30   :  { %1044 = vmatpush3.bf16.msra.mxu0 %v1146_v54 }
  0x31   :  { %1066 = vmatpush3.bf16.msra.mxu1 %v1147_v55  ;;  %1045 = vmatprep.subr.bf16.mxu0 %v1148_v56 }
  0x32   :  { %1067 = vmatprep.subr.bf16.mxu1 %v1149_v57 }
  0x34   :  { %1046 = vmatpush3.bf16.msra.mxu0 %v1150_v58 }
  0x35   :  { %1068 = vmatpush3.bf16.msra.mxu1 %v1151_v59  ;;  %1047 = vmatprep.subr.bf16.mxu0 %v1152_v60 }
  0x36   :  { %1069 = vmatprep.subr.bf16.mxu1 %v1153_v61 }
  0x38   :  { %1048 = vmatpush3.bf16.msra.mxu0 %v1154_v62 }
  0x39   :  { %1070 = vmatpush3.bf16.msra.mxu1 %v1155_v63  ;;  %1049 = vmatprep.subr.bf16.mxu0 %v1156_v0 }
  0x3a   :  { %1071 = vmatprep.subr.bf16.mxu1 %v1157_v1 }
  0x3c   :  { %1050 = vmatpush3.bf16.msra.mxu0 %v1158_v2 }
  0x3d   :  { %1072 = vmatpush3.bf16.msra.mxu1 %v1159_v3  ;;  %1051 = vmatprep.subr.bf16.mxu0 %v1160_v4 }
  0x3e   :  { %1073 = vmatprep.subr.bf16.mxu1 %v1161_v5 }
  0x40   :  { %1052 = vmatpush3.bf16.msra.mxu0 %v1162_v6 }
  0x41   :  { %8 = vsyncpa [#allocation3], 0  ;;  %1074 = vmatpush3.bf16.msra.mxu1 %v1163_v7  ;;  %v922_v14 = vcombine.low %v19_v12, %v23_v13  ;;  %v923_v15 = vcombine.high %v19_v12, %v23_v13  ;;  %691 = vmatprep.mubr.bf16.mxu0 %v921_v11  ;;  %v744_v16 = vld [vmem:[%s1487_s2 + $0x8] sm:$0xff]  ;;  %v746_v17 = vld [vmem:[%s1487_s2 + $0x18] sm:$0xff]  ;;  %v1196_v28 = vmov 0.0   ;;  %vm764_vm0 = vcmask 261120  }
  0x42   :  { %v1081_v18 = vpack.c.bf16 %v746_v17, %v744_v16  ;;  %v743_v19 = vld [vmem:[%s1487_s2] sm:$0xff]  ;;  %v745_v20 = vld [vmem:[%s1487_s2 + $0x10] sm:$0xff]  ;;  %v748_v22 = vld [vmem:[%s1487_s2 + $0x28] sm:$0xff]  ;;  %v754_v4 = vlaneseq  ;;  %s1198_s16 = smov [#allocation2]  }
  0x43   :  { %732 = vmatprep.mubr.bf16.mxu1 %v923_v15  ;;  %692 = vmatmul.mubr.bf16.vlgmr.msra.gmra.mrb[4].mxu0 %v920_v10  ;;  %v1083_v21 = vpack.c.bf16 %v745_v20, %v743_v19  ;;  %v750_v23 = vld [vmem:[%s1487_s2 + $0x38] sm:$0xff]  ;;  %v747_v25 = vld [vmem:[%s1487_s2 + $0x20] sm:$0xff]  ;;  %v749_v26 = vld [vmem:[%s1487_s2 + $0x30] sm:$0xff]  ;;  %s905_s17 = sshll.u32 %s1198_s16, 4  ;;  %s906_s17 = int_to_ptr.vmem [resolvable:$true] %s905_s17 }
  0x44   :  { %733 = vmatmul.mubr.bf16.vlgmr.msra.gmra.mrb[4].mxu1 %v922_v14  ;;  %1082 = vmatprep.subr.bf16.mxu0 %v1081_v18  ;;  %v1085_v24 = vpack.c.bf16 %v750_v23, %v748_v22  ;;  %v1087_v27 = vpack.c.bf16 %v749_v26, %v747_v25  ;;  %v152_v31 = vld [vmem:[%s1487_s2 + $0x40] ss:$0 sm:$0xff]  ;;  %v755_v5 = vshrl.u32 %v754_v4, 7  ;;  %v988_v7 = vld [vmem:[%s1487_s2 + $0x41] ss:$8 sm:$0x3]  ;;  %p1177_p1 = scmp.lt.s32.totalorder %s906_s17, %s906_s17 }
  0x45   :  { %1089 = vmatprep.subr.bf16.mxu1 %v1081_v18  ;;  %1084 = vmatpush1.bf16.msra.mxu0 %v1083_v21  ;;  %v1197_v23 = vmov 0   ;;  %s1172_s18 = scalar_lea.vmem %s906_s17, 256 }
  0x46   :  { %1091 = vmatpush1.bf16.msra.mxu1 %v1083_v21  ;;  %1086 = vmatprep.subr.bf16.mxu0 %v1085_v24  ;;  %v760_v6 = vsub.s32 1, %v755_v5  ;;  %p1173_p0 = scmp.ne.s32.totalorder %s906_s17, %s1172_s18  ;;  %p1178_p2 = scmp.lt.s32.totalorder %s1172_s18, %s1172_s18 }
  0x47   :  { %1090 = vmatprep.subr.bf16.mxu1 %v1085_v24  ;;  %835 = vmatprep.mubr.f32.mxu0 %v1196_v28 }
  0x48   :  { %841 = vmatprep.mubr.f32.mxu1 %v1196_v28  ;;  %v761_v8 = vrot.slane %v988_v7, %v760_v6  ;;  %1098 = vset.pattern.permute.xlu0 %v1197_v23  ;;  %p1179_p3 = por %p1178_p2, %p1177_p1 }
  0x49   :  { %1088 = vmatpush1.bf16.msra.mxu0 %v1087_v27  ;;  %1099 = vset.pattern.permute.xlu1 %v1197_v23 }
  0x4a   :  { %1092 = vmatpush1.bf16.msra.mxu1 %v1087_v27  ;;  %p1180_p4 = pnand %p1179_p3, %p1173_p0 }
  0xf6   :  { %v1009_v29 = vpop.f32.mrb[0].mxu0 }
  0xf7   :  { %v1031_v30 = vpop.f32.mrb[0].mxu1  ;;  %v1010_v32 = vpop.f32.mrb[1].mxu0 }
  0xf8   :  { %v1011_v33 = vadd.f32 %v1010_v32, %v1009_v29  ;;  %v1032_v34 = vpop.f32.mrb[1].mxu1  ;;  %v1012_v35 = vpop.f32.mrb[2].mxu0 }
  0xf9   :  { %v1033_v36 = vadd.f32 %v1032_v34, %v1031_v30  ;;  %v1034_v37 = vpop.f32.mrb[2].mxu1  ;;  %v1013_v38 = vpop.f32.mrb[3].mxu0 }
  0xfa   :  { %v612_v39 = vadd.f32 %v1011_v33, %v152_v31  ;;  %v1014_v40 = vadd.f32 %v1013_v38, %v1012_v35  ;;  %v1035_v41 = vpop.f32.mrb[3].mxu1  ;;  %v882_v35 = vld [vmem:[%s1487_s2 + $0x43] ss:$0 sm:$0xff] }
  0xfb   :  { %v1036_v42 = vadd.f32 %v1035_v41, %v1034_v37 }
  0xfc   :  { %v653_v43 = vadd.f32 %v1033_v36, %v612_v39  ;;  %v615_v44 = vadd.f32 %v1014_v40, %v152_v31 }
  0xfe   :  { %v656_v45 = vadd.f32 %v1036_v42, %v615_v44 }
 0x116   :  { %v1053_v46 = vpop.f32.mrb[4].mxu0 }
 0x117   :  { %v1075_v47 = vpop.f32.mrb[4].mxu1  ;;  %v1054_v48 = vpop.f32.mrb[5].mxu0 }
 0x118   :  { %v1055_v49 = vadd.f32 %v1054_v48, %v1053_v46  ;;  %v1076_v50 = vpop.f32.mrb[5].mxu1  ;;  %v1056_v51 = vpop.f32.mrb[6].mxu0 }
 0x119   :  { %v1077_v52 = vadd.f32 %v1076_v50, %v1075_v47  ;;  %v1078_v53 = vpop.f32.mrb[6].mxu1  ;;  %v1057_v54 = vpop.f32.mrb[7].mxu0 }
 0x11a   :  { %v694_v55 = vadd.f32 %v1055_v49, %v653_v43  ;;  %v1058_v56 = vadd.f32 %v1057_v54, %v1056_v51  ;;  %v1079_v57 = vpop.f32.mrb[7].mxu1  ;;  %v756_v43 = vsub.s32 0, %v755_v5 }
 0x11b   :  { %v1080_v58 = vadd.f32 %v1079_v57, %v1078_v53 }
 0x11c   :  { %v735_v59 = vadd.f32 %v1077_v52, %v694_v55  ;;  %v697_v60 = vadd.f32 %v1058_v56, %v656_v45  ;;  %v757_v44 = vrot.slane %v988_v7, %v756_v43  ;;  %v885_v45 = vld [vmem:[%s1487_s2 + $0x42] ss:$0 sm:$0xff] }
 0x11e   :  { %v741_v61 = vmax.f32 %v735_v59, 0.0  ;;  %v738_v62 = vadd.f32 %v1080_v58, %v697_v60 }
 0x120   :  { %v742_v63 = vmax.f32 %v738_v62, 0.0  ;;  %989 = vmatmul.mubr.msk.f32.vlgmr.msra.gmra.mrb[8].mxu0 %vm764_vm0, %v741_v61  ;;  %v868_v0 = vmul.f32 %v741_v61, %v741_v61 }
 0x122   :  { %990 = vmatmul.mubr.msk.f32.vlgmr.msra.gmra.mrb[8].mxu1 %vm764_vm0, %v742_v63  ;;  %v870_v1 = vsel %vm764_vm0, %v868_v0, 0.0  ;;  %v869_v2 = vmul.f32 %v742_v63, %v742_v63 }
 0x124   :  { %v873_v3 = vsel %vm764_vm0, %v869_v2, 0.0 }
 0x1f3   :  { %v837_v9 = vpop.f32.mrb[8].mxu0 }
 0x1f4   :  { %v839_v10 = vpop.f32.mrb[9].mxu0  ;;  %v838_v46 = vadd.f32 %v837_v9, %v757_v44 }
 0x1f5   :  { %v840_v11 = vadd.f32 %v839_v10, %v761_v8  ;;  %v843_v12 = vpop.f32.mrb[8].mxu1 }
 0x1f6   :  { %v845_v13 = vpop.f32.mrb[9].mxu1  ;;  %v844_v49 = vadd.f32 %v843_v12, %v757_v44 }
 0x1f7   :  { %848 = vmax.xlane.f32.xlu0 %v840_v11  ;;  %v846_v14 = vadd.f32 %v845_v13, %v761_v8 }
 0x1fb   :  { %850 = vmax.xlane.f32.xlu0 %v846_v14 }
 0x1ff   :  { %871 = vadd.xlane.f32.xlu0 %v870_v1 }
 0x284   :  { %v849_v15 = vpop.xlane.xlu0 %848 }
 0x285   :  { %v852_v16 = vsub.f32 %v840_v11, %v849_v15 }
 0x287   :  { %v854_v17 = vmul.f32 1.442695, %v852_v16 }
 0x288   :  { %v851_v18 = vpop.xlane.xlu0 %850 }
 0x289   :  { %v853_v19 = vsub.f32 %v846_v14, %v851_v18  ;;  %1164 = vpow2.f32 %v854_v17 }
 0x28b   :  { %v856_v20 = vmul.f32 1.442695, %v853_v19 }
 0x28c   :  { %v872_v27 = vpop.xlane.xlu0 %871 }
 0x28d   :  { %1166 = vpow2.f32 %v856_v20  ;;  %v876_v29 = vmul.f32 7.3964496, %v872_v27 }
 0x293   :  { %v1165_v21 = vpop.eup %1164 }
 0x294   :  { %858 = vadd.xlane.f32.xlu1 %v1165_v21 }
 0x297   :  { %v1167_v22 = vpop.eup %1166 }
 0x298   :  { %860 = vadd.xlane.f32.xlu1 %v1167_v22 }
 0x29c   :  { %874 = vadd.xlane.f32.xlu1 %v873_v3 }
 0x321   :  { %v859_v24 = vpop.xlane.xlu1 %858 }
 0x322   :  { %1168 = vlog2.f32 %v859_v24 }
 0x325   :  { %v861_v25 = vpop.xlane.xlu1 %860 }
 0x326   :  { %1170 = vlog2.f32 %v861_v25 }
 0x329   :  { %v875_v32 = vpop.xlane.xlu1 %874 }
 0x32a   :  { %v877_v37 = vmul.f32 7.3964496, %v875_v32 }
 0x32c   :  { %v1169_v26 = vpop.eup %1168 }
 0x32d   :  { %v863_v28 = vmul.f32 0.6931472, %v1169_v26 }
 0x32f   :  { %v866_v30 = vadd.f32 %v863_v28, %v849_v15 }
 0x330   :  { %v1171_v31 = vpop.eup %1170 }
 0x331   :  { %v865_v33 = vmul.f32 0.6931472, %v1171_v31  ;;  %v878_v34 = vsub.f32 %v866_v30, %v876_v29 }
 0x333   :  { %v867_v36 = vadd.f32 %v865_v33, %v851_v18  ;;  %v991_v38 = vadd.f32 8.848293, %v878_v34 }
 0x335   :  { %v879_v39 = vsub.f32 %v867_v36, %v877_v37  ;;  %vm883_vm1 = vcmp.lt.f32.partialorder %v991_v38, %v882_v35 }
 0x336   :  { %v886_v40 = vsel %vm883_vm1, 1, %v1197_v23 }
 0x337   :  { %v992_v41 = vadd.f32 8.848293, %v879_v39  ;;  %889 = vperm.xlu0 %1098, %v886_v40  }
 0x339   :  { %vm884_vm2 = vcmp.lt.f32.partialorder %v992_v41, %v882_v35 }
 0x33a   :  { %v887_v42 = vsel %vm884_vm2, 1, %v1197_v23 }
 0x33b   :  { %892 = vperm.xlu1 %1099, %v887_v42  }
 0x3b6   :  { %v890_v47 = vpop.permute.xlu0 %889 }
 0x3b7   :  { %vm894_vm3 = vcmp.eq.s32.totalorder %v890_v47, 1 }
 0x3b8   :  { %v896_v48 = vsel %vm894_vm3, %v885_v45, %v838_v46 }
 0x3b9   :  { %898 = vst [vmem:[#allocation2] sm:$0xff] %v896_v48 }
 0x3ba   :  { %v893_v50 = vpop.permute.xlu1 %892 }
 0x3bb   :  { %vm895_vm4 = vcmp.eq.s32.totalorder %v893_v50, 1 }
 0x3bc   :  { %v897_v51 = vsel %vm895_vm4, %v885_v45, %v844_v49 }
 0x3bd   :  { %899 = vst [vmem:[#allocation2 + $0x8] sm:$0xff] %v897_v51 }
 0x3be   :  { %1183 = shalt.err (!%p1180_p4)
}
 0x3bf   :  { %s1184_s20 = scalar_lea.hbm %s1488_s3, 256 }
 0x3c0   :  { %p1185_p5 = scmp.ne.s32.totalorder %s1488_s3, %s1184_s20  ;;  %p1188_p6 = scmp.lt.u32.totalorder %s1184_s20, %s1488_s3 }
 0x3c2   :  { %p1190_p7 = pnand %p1188_p6, %p1185_p5 }
 0x3c4   :  { %1193 = shalt.err (!%p1190_p7)
}
 0x3c5   :  { %s1199_s24 = smov 128   ;;  %s1200_s25 = smov 8  }
 0x3c6   :  { %911 = dma.vmem_to_hbm [thread:$0]  %s906_s17, 256, %s1488_s3, [#allocation3], %s1199_s24, %s1199_s24, %s1200_s25  }
 0x3c7   :  { %1194 = dma.done.wait [#allocation3], 256  }
 0x3c8   :  { %1195 = vsyncadd [#allocation3], 4294967040 }
 0x3c9   :  { %915 = vsyncpa [#allocation3], 1 }

</bundles_post_ra>
